<compile_context>
chip_gen: v6e
topology: v6e:2x2x1
jax: 0.10.0
libtpu: 0.0.40
codegen_flags: <defaults>
</compile_context>

<pallas_src>
import functools

import jax
import jax.numpy as jnp
from jax import lax
from jax.experimental import pallas as pl
from jax.experimental.pallas import tpu as pltpu


def _round_up(n, m):
    return ((n + m - 1) // m) * m


def _rbf_ban_kernel(x_ref, ct_ref, csq_ref, w_ref, out_ref, acc_ref, *,
                    alpha, beta):
    # x_ref:   (TB, D)  batch tile, original dtype (cast to f32 in-kernel)
    # ct_ref:  (D, TC)  -2 * centers^T, current center tile (f32)
    # csq_ref: (1, TC)  ||c||^2, current center tile (f32)
    # w_ref:   (TC, O)  weights (exact-zero rows for padded centers)
    # out_ref: (TB, O)  output tile, stored at the last center step
    # acc_ref: (TB, O)  f32 accumulator scratch
    k = pl.program_id(1)

    @pl.when(k == 0)
    def _():
        acc_ref[...] = jnp.zeros_like(acc_ref)

    x = x_ref[...].astype(jnp.float32)                                  # (TB, D)
    ct = ct_ref[...]                                                    # (D, TC)
    csq = csq_ref[...]                                                  # (1, TC)
    w = w_ref[...]                                                      # (TC, O)

    # Squared distances ||x||^2 - 2 x.c + ||c||^2; the cross term is an MXU
    # matmul with the -2 pre-folded into ct.  The eps clamp keeps phi finite
    # when a point coincides with a center (PyTorch emits inf/NaN there).
    x_sq = jnp.sum(x * x, axis=-1, keepdims=True)                       # (TB, 1)
    xc = jnp.dot(x, ct, preferred_element_type=jnp.float32)             # (TB, TC)
    d2 = jnp.maximum(x_sq + xc + csq, 1e-12)

    # Yukawa RBF beta/d * exp(-alpha*d): rsqrt and exp run on the EUP.
    inv_d = lax.rsqrt(d2)
    d = d2 * inv_d
    phi = (beta * inv_d) * jnp.exp(-alpha * d)                          # (TB, TC)

    # Padded center columns contribute exactly zero through the zero rows of w.
    acc_ref[...] += jnp.dot(phi.astype(w.dtype), w,
                            preferred_element_type=jnp.float32)

    @pl.when(k == pl.num_programs(1) - 1)
    def _():
        out_ref[...] = acc_ref[...].astype(out_ref.dtype)


def rbf_ban_forward(x, centers, weights, *, alpha=0.5, beta=1.0,
                    batch_tile=512, center_tile=None, matmul_in_bf16=None):
    B, D = x.shape
    C, Dc = centers.shape
    Cw, O = weights.shape
    assert D == Dc and C == Cw

    f32 = jnp.float32
    out_dtype = x.dtype
    out_itemsize = x.dtype.itemsize

    # bf16 on phi @ w only pays when the MXU (not the EUP chain over (TB, C))
    # is the binding unit, i.e. large C and O.  Never used on the distance
    # matmul (catastrophic-cancellation risk for points near centers).
    if matmul_in_bf16 is None:
        matmul_in_bf16 = (O >= 256 and C >= 256)
    w_dtype = jnp.bfloat16 if matmul_in_bf16 else f32
    w_itemsize = 2 if matmul_in_bf16 else 4

    # --- batch tiling ------------------------------------------------------
    # Big tiles amortize the ~0.35 us/step pipeline overhead; cap by a ~16 MiB
    # x-tile budget for very wide D; split small batches into two tiles so the
    # "parallel" axis has work for both v7x TensorCores.
    tb = min(batch_tile, max(8, ((16 << 20) // (8 * max(D, 1))) // 8 * 8))
    tb = min(tb, max(8, _round_up(pl.cdiv(B, 2), 8)))
    nb = pl.cdiv(B, tb)

    # --- center tiling -------------------------------------------------------
    # Keep centers/weights fully resident when small; otherwise stream them in
    # lane-aligned tiles sized to a ~12 MiB per-buffer budget (safe on v7x).
    c_pad128 = _round_up(C, 128)
    per_col_bytes = 4 * (D + 1) + w_itemsize * O
    if center_tile is None:
        tc = max(128, min(c_pad128, ((12 << 20) // per_col_bytes) // 128 * 128))
    else:
        tc = max(128, min(_round_up(center_tile, 128), c_pad128))
    c_pad = _round_up(C, tc)
    nc = c_pad // tc
    # TODO(synk): for extreme D*O where even a 128-wide center tile exceeds the
    # budget, also tile D/O; not needed for realistic RBF layer sizes.

    # --- one-time wrapper-side layout of the small center-side operands ------
    c32 = centers.astype(f32)
    ct_p = jnp.zeros((D, c_pad), f32).at[:, :C].set(-2.0 * c32.T)
    csq_p = jnp.zeros((1, c_pad), f32).at[:, :C].set(
        jnp.sum(c32 * c32, axis=-1)[None, :])
    # Invariant: rows >= C of w_p stay exactly zero — padded center columns
    # produce a finite nonzero phi and are cancelled only through these rows.
    w_p = jnp.zeros((c_pad, O), w_dtype).at[:C, :].set(weights.astype(w_dtype))

    # --- VMEM accounting (headroom included; clamp <= 56 MiB for v7x) --------
    center_bufs = 1 if nc == 1 else 2
    block_bytes = (2 * tb * D * x.dtype.itemsize        # x tiles (double-buffered)
                   + 2 * tb * O * out_itemsize          # out tiles
                   + tb * O * 4                         # f32 accumulator scratch
                   + center_bufs * tc * per_col_bytes)  # center-side tiles
    vmem_limit = int(min(max(block_bytes + (16 << 20), 32 << 20), 56 << 20))

    # Grid-invariant center-side operands (nc == 1): single-buffer them to
    # halve their resident VMEM footprint.
    center_kw = dict(pipeline_mode=pl.Buffered(1)) if nc == 1 else {}

    kernel = functools.partial(_rbf_ban_kernel, alpha=float(alpha),
                               beta=float(beta))

    return pl.pallas_call(
        kernel,
        out_shape=jax.ShapeDtypeStruct((B, O), out_dtype),
        grid_spec=pltpu.PrefetchScalarGridSpec(
            num_scalar_prefetch=0,
            grid=(nb, nc),
            in_specs=[
                pl.BlockSpec((tb, D), lambda i, k: (i, 0)),               # x
                pl.BlockSpec((D, tc), lambda i, k: (0, k), **center_kw),  # -2 c^T
                pl.BlockSpec((1, tc), lambda i, k: (0, k), **center_kw),  # ||c||^2
                pl.BlockSpec((tc, O), lambda i, k: (k, 0), **center_kw),  # weights
            ],
            out_specs=pl.BlockSpec((tb, O), lambda i, k: (i, 0)),
            scratch_shapes=[pltpu.VMEM((tb, O), jnp.float32)],
        ),
        compiler_params=pltpu.CompilerParams(
            dimension_semantics=("parallel", "arbitrary"),
            vmem_limit_bytes=vmem_limit,
        ),
    )(x, ct_p, csq_p, w_p)


def rbf_ban_reference(x, centers, weights, *, alpha=0.5, beta=1.0):
    # Pure-JAX reference matching the PyTorch forward.
    diff = x[:, None, :] - centers[None, :, :]                        # (B, C, D)
    d = jnp.sqrt(jnp.sum(diff * diff, axis=-1))                       # (B, C)
    phi = beta / d * jnp.exp(-alpha * d)                              # (B, C)
    return jnp.sum(phi[:, :, None] * weights[None, :, :], axis=1)     # (B, O)


def xavier_uniform(key, shape, dtype=jnp.float32):
    # torch.nn.init.xavier_uniform_ on 2D: fan_in = shape[1], fan_out = shape[0]
    fan_in, fan_out = shape[1], shape[0]
    bound = (6.0 / (fan_in + fan_out)) ** 0.5
    return jax.random.uniform(key, shape, dtype=dtype, minval=-bound, maxval=bound)


if __name__ == "__main__":
    # Small shapes consistent with the module: x is (batch, input_dim).
    batch = 16
    input_dim = 32
    num_centers = 24
    output_dim = 32
    alpha, beta = 0.5, 1.0

    key = jax.random.PRNGKey(0)
    k_x, k_c, k_w = jax.random.split(key, 3)

    x = jax.random.normal(k_x, (batch, input_dim), dtype=jnp.float32)
    centers = xavier_uniform(k_c, (num_centers, input_dim))
    weights = xavier_uniform(k_w, (num_centers, output_dim))

    fwd = jax.jit(functools.partial(rbf_ban_forward, alpha=alpha, beta=beta))
    out = jax.block_until_ready(fwd(x, centers, weights))

    ref = rbf_ban_reference(x, centers, weights, alpha=alpha, beta=beta)
    assert out.shape == (batch, output_dim)
    assert jnp.allclose(out, ref, atol=1e-4, rtol=1e-4), "mismatch vs reference"

    print("KERNEL_OK")
</pallas_src>

<mosaic_0001>
module attributes {stable_mosaic.version = 11 : i64} {
  func.func @_rbf_ban_kernel(%arg0: i32, %arg1: i32, %arg2: memref<8x32xf32, #tpu.memory_space<vmem>>, %arg3: memref<32x128xf32, #tpu.memory_space<vmem>>, %arg4: memref<1x128xf32, #tpu.memory_space<vmem>>, %arg5: memref<128x32xf32, #tpu.memory_space<vmem>>, %arg6: memref<8x32xf32, #tpu.memory_space<vmem>>, %arg7: memref<8x32xf32, #tpu.memory_space<vmem>>) attributes {dimension_semantics = [#tpu.dimension_semantics<parallel>, #tpu.dimension_semantics<arbitrary>], iteration_bounds = array<i64: 2, 1>, scalar_prefetch = 0 : i64, scratch_operands = 1 : i64, tpu.core_type = #tpu.core_type<tc>, window_params = [{transform_indices = @transform_0, window_bounds = array<i64: 8, 32>}, {pipeline_mode = #tpu.pipeline_mode<synchronous>, transform_indices = @transform_1, window_bounds = array<i64: 32, 128>}, {pipeline_mode = #tpu.pipeline_mode<synchronous>, transform_indices = @transform_2, window_bounds = array<i64: 1, 128>}, {pipeline_mode = #tpu.pipeline_mode<synchronous>, transform_indices = @transform_3, window_bounds = array<i64: 128, 32>}, {transform_indices = @transform_4, window_bounds = array<i64: 8, 32>}]} {
    %c0_i32 = arith.constant 0 : i32
    %0 = arith.cmpi eq, %arg1, %c0_i32 : i32
    %1 = arith.extui %0 : i1 to i32
    %c0_i32_0 = arith.constant 0 : i32
    %2 = arith.cmpi ne, %1, %c0_i32_0 : i32
    scf.if %2 {
      %cst_19 = arith.constant 0.000000e+00 : f32
      %32 = vector.broadcast %cst_19 : f32 to vector<8x32xf32>
      %c0_20 = arith.constant 0 : index
      %c0_21 = arith.constant 0 : index
      %33 = vector.load %arg7[%c0_20, %c0_21] : memref<8x32xf32, #tpu.memory_space<vmem>>, vector<8x32xf32>
      tpu.vector_store %arg7[%c0_20, %c0_21], %32 {strides = array<i32>} : memref<8x32xf32, #tpu.memory_space<vmem>>, vector<8x32xf32>,
    } else {
    }
    %c0 = arith.constant 0 : index
    %c0_1 = arith.constant 0 : index
    %3 = vector.load %arg2[%c0, %c0_1] : memref<8x32xf32, #tpu.memory_space<vmem>>, vector<8x32xf32>
    %c0_2 = arith.constant 0 : index
    %c0_3 = arith.constant 0 : index
    %4 = vector.load %arg3[%c0_2, %c0_3] : memref<32x128xf32, #tpu.memory_space<vmem>>, vector<32x128xf32>
    %c0_4 = arith.constant 0 : index
    %c0_5 = arith.constant 0 : index
    %5 = vector.load %arg4[%c0_4, %c0_5] : memref<1x128xf32, #tpu.memory_space<vmem>>, vector<1x128xf32>
    %c0_6 = arith.constant 0 : index
    %c0_7 = arith.constant 0 : index
    %6 = vector.load %arg5[%c0_6, %c0_7] : memref<128x32xf32, #tpu.memory_space<vmem>>, vector<128x32xf32>
    %7 = arith.mulf %3, %3 : vector<8x32xf32>
    %cst = arith.constant dense<0.000000e+00> : vector<8xf32>
    %8 = vector.multi_reduction <add>, %7, %cst [1] : vector<8x32xf32> to vector<8xf32>
    %9 = vector.shape_cast %8 : vector<8xf32> to vector<8x1xf32>
    %cst_8 = arith.constant dense<0.000000e+00> : vector<8x128xf32>
    %10 = tpu.matmul %3, %4, %cst_8 {dimension_numbers = #tpu.dot_dimension_numbers<[1], [0], [0], [1], [0, 0, 1, 1], [], []>} : vector<8x32xf32>, vector<32x128xf32>, vector<8x128xf32> -> vector<8x128xf32>
    %11 = vector.broadcast %9 : vector<8x1xf32> to vector<8x128xf32>
    %12 = arith.addf %11, %10 : vector<8x128xf32>
    %13 = vector.broadcast %5 : vector<1x128xf32> to vector<8x128xf32>
    %14 = arith.addf %12, %13 : vector<8x128xf32>
    %cst_9 = arith.constant 9.99999996E-13 : f32
    %15 = vector.broadcast %cst_9 : f32 to vector<8x128xf32>
    %16 = arith.maximumf %14, %15 : vector<8x128xf32>
    %17 = math.rsqrt %16 : vector<8x128xf32>
    %18 = arith.mulf %16, %17 : vector<8x128xf32>
    %cst_10 = arith.constant 1.000000e+00 : f32
    %19 = vector.broadcast %cst_10 : f32 to vector<8x128xf32>
    %20 = arith.mulf %19, %17 : vector<8x128xf32>
    %cst_11 = arith.constant -5.000000e-01 : f32
    %21 = vector.broadcast %cst_11 : f32 to vector<8x128xf32>
    %22 = arith.mulf %21, %18 : vector<8x128xf32>
    %23 = math.exp %22 : vector<8x128xf32>
    %24 = arith.mulf %20, %23 : vector<8x128xf32>
    %c0_12 = arith.constant 0 : index
    %c0_13 = arith.constant 0 : index
    %25 = vector.load %arg7[%c0_12, %c0_13] : memref<8x32xf32, #tpu.memory_space<vmem>>, vector<8x32xf32>
    %cst_14 = arith.constant dense<0.000000e+00> : vector<8x32xf32>
    %26 = tpu.matmul %24, %6, %cst_14 {dimension_numbers = #tpu.dot_dimension_numbers<[1], [0], [0], [1], [0, 0, 1, 1], [], []>} : vector<8x128xf32>, vector<128x32xf32>, vector<8x32xf32> -> vector<8x32xf32>
    %27 = arith.addf %25, %26 : vector<8x32xf32>
    %c0_15 = arith.constant 0 : index
    %c0_16 = arith.constant 0 : index
    %28 = vector.load %arg7[%c0_15, %c0_16] : memref<8x32xf32, #tpu.memory_space<vmem>>, vector<8x32xf32>
    tpu.vector_store %arg7[%c0_15, %c0_16], %27 {strides = array<i32>} : memref<8x32xf32, #tpu.memory_space<vmem>>, vector<8x32xf32>,
    %c0_i32_17 = arith.constant 0 : i32
    %29 = arith.cmpi eq, %arg1, %c0_i32_17 : i32
    %30 = arith.extui %29 : i1 to i32
    %c0_i32_18 = arith.constant 0 : i32
    %31 = arith.cmpi ne, %30, %c0_i32_18 : i32
    scf.if %31 {
      %c0_19 = arith.constant 0 : index
      %c0_20 = arith.constant 0 : index
      %32 = vector.load %arg7[%c0_19, %c0_20] : memref<8x32xf32, #tpu.memory_space<vmem>>, vector<8x32xf32>
      %c0_21 = arith.constant 0 : index
      %c0_22 = arith.constant 0 : index
      %33 = vector.load %arg6[%c0_21, %c0_22] : memref<8x32xf32, #tpu.memory_space<vmem>>, vector<8x32xf32>
      tpu.vector_store %arg6[%c0_21, %c0_22], %32 {strides = array<i32>} : memref<8x32xf32, #tpu.memory_space<vmem>>, vector<8x32xf32>,
    } else {
    }
    return
  }
  func.func @transform_0(%arg0: i32, %arg1: i32) -> (i32, i32) {
    %c0_i32 = arith.constant 0 : i32
    %c0_i32_0 = arith.constant 0 : i32
    return %arg0, %c0_i32 : i32, i32
  }
  func.func @transform_1(%arg0: i32, %arg1: i32) -> (i32, i32) {
    %c0_i32 = arith.constant 0 : i32
    %c0_i32_0 = arith.constant 0 : i32
    return %c0_i32, %arg1 : i32, i32
  }
  func.func @transform_2(%arg0: i32, %arg1: i32) -> (i32, i32) {
    %c0_i32 = arith.constant 0 : i32
    %c0_i32_0 = arith.constant 0 : i32
    return %c0_i32, %arg1 : i32, i32
  }
  func.func @transform_3(%arg0: i32, %arg1: i32) -> (i32, i32) {
    %c0_i32 = arith.constant 0 : i32
    %c0_i32_0 = arith.constant 0 : i32
    return %arg1, %c0_i32 : i32, i32
  }
  func.func @transform_4(%arg0: i32, %arg1: i32) -> (i32, i32) {
    %c0_i32 = arith.constant 0 : i32
    %c0_i32_0 = arith.constant 0 : i32
    return %arg0, %c0_i32 : i32, i32
  }
}

</mosaic_0001>

<bundles_post_ra>
// kernel: rbf_ban_forward.1
= control target key start
LH: loop header
LB: loop body
LE: loop exit
PB: predicated region body
PF: predicated region fallthrough
CT: control target
= control target key end

     0   :  { %9 = vsyncpa [#allocation4], 0  ;;  %s1027_s0 = inlined_call_operand.vmem [shape: f32[16,32], index: 0, kind: input, shape index: {}]   ;;  %s1028_s1 = inlined_call_operand.vmem [shape: f32[32,128], index: 1, kind: input, shape index: {}]   ;;  %s1029_s2 = inlined_call_operand.vmem [shape: f32[1,128], index: 2, kind: input, shape index: {}]   ;;  %s1030_s3 = inlined_call_operand.vmem [shape: f32[128,32], index: 3, kind: input, shape index: {}]   ;;  %s1031_s4 = inlined_call_operand.hbm [shape: f32[16,32], index: 4, kind: output, shape index: {}]  }
   0x1   :  { %11 = vsyncpa [#allocation4 + $0x1], 0  ;;  %s831_s15 = smov 0   ;;  %s833_s16 = smov 0  }
   0x2   :  { %s835_s17 = smov 0   ;;  %s837_s18 = smov 0  }
   0x3   :  { %s839_s19 = smov 0   ;;  %s841_s20 = smov 0  }
   0x4 LB: > { %s580_s21 = sadd.s32 4294967295, %s801_s20   ;;  %s581_s22 = sadd.s32 4294967294, %s801_s20   ;;  %s801_s20 = sphi %s841_s20, %s17_s20   ;;  %s797_s19 = sphi %s839_s19, %s1038_s19   ;;  %s793_s18 = sphi %s837_s18, %s1037_s18   ;;  %s789_s17 = sphi %s835_s17, %s1036_s17   ;;  %s785_s16 = sphi %s833_s16, %s1035_s16   ;;  %s781_s15 = sphi %s831_s15, %s1034_s15  }
   0x5   : > { %s29_s23 = sadd.s32 1, %s797_s19  ;;  %s140_s24 = sadd.s32 1, %s789_s17 }
   0x6   : > { %p31_p0 = scmp.ge.s32.totalorder %s29_s23, 2  ;;  %p150_p1 = scmp.ne.s32.totalorder %s789_s17, %s785_s16 }
   0x7   : > { %p151_p2 = scmp.eq.s32.totalorder %s580_s21, 1  ;;  %p156_p3 = scmp.ne.s32.totalorder %s785_s16, %s781_s15 }
   0x8   : > { %s1040_s23 = smov (%p31_p0, %s29_s23), 0  ;;  %p157_p5 = scmp.eq.s32.totalorder %s581_s22, 1 }
   0x9   : > { %p871_p4 = por %p151_p2, %p150_p1  ;;  %s137_s26 = ssub.s32 %s797_s19, %s1040_s23 }
   0xa   : > { %p587_p6 = scmp.ge.s32.totalorder %s801_s20, 1  ;;  %p138_p7 = scmp.eq.s32.totalorder %s137_s26, 0 }
   0xb   : > { %p878_p8 = por %p157_p5, %p156_p3  ;;  %p204_p9 = scmp.lt.s32.totalorder %s801_s20, 3 }
   0xc   : > { %s884_s28 = scalar_select %p138_p7, %s789_s17, %s140_s24  }
   0xd   : > { %p205_p10 = pnand %p587_p6, %p204_p9 }
   0xe   : > { %p241_p11 = scmp.lt.s32.totalorder (!%p205_p10), %s793_s18, 1  ;;  %s238_s26 = sand.u32 (!%p205_p10), 1, %s785_s16  }
   0xf   : > { %208 = sbr.rel (%p205_p10) target bundleno = 480 (0x1e0), region = 36  ;;  %s588_s29 = sshll.u32 (!%p205_p10), %s238_s26, 3 }
  0x10   : > { %s593_s30 = sshll.u32 (!%p205_p10), %s793_s18, 7  ;;  %s240_s5 = scalar_lea.vmem (!%p205_p10), [#allocation3], %s588_s29 }
  0x11   : > { %s471_s6 = sshll.u32 (!%p205_p10), %s240_s5, 4  ;;  %s986_s9 = scalar_lea.hbm (!%p205_p10), %s1031_s4, %s593_s30  ;;  %s472_s6 = int_to_ptr.vmem [resolvable:$true] %s471_s6 }
  0x12   : > { %s725_s11 = scalar_lea.vmem (!%p205_p10), %s472_s6, 128  ;;  %s805_s12 = smov (!%p205_p10), [#allocation3]  }
  0x13   : > { %p726_p12 = scmp.ne.s32.totalorder (!%p205_p10), %s472_s6, %s725_s11  ;;  %s729_s13 = sshll.u32 (!%p205_p10), %s805_s12, 4  ;;  %s730_s13 = int_to_ptr.vmem [resolvable:$false] %s729_s13 }
  0x14   : > { %v268_v0 = vld [vmem:[%s1028_s1 + $0x18] sm:$0xff]  ;;  %v803_v1 = vmov 0.0   ;;  %v267_v2 = vld [vmem:[%s1028_s1 + $0x10] sm:$0xff]  ;;  %vm804_vm0 = vmmov 0   ;;  %vm262_vm1 = vcmask 261120   ;;  %s242_s7 = scalar_select %p241_p11, %s793_s18, 1 }
  0x15   : > { %618 = vmatprep.subr.mxu0 %v803_v1  ;;  %626 = vmatprep.mubr.msk.f32.mxu0 %vm804_vm0, %v803_v1  ;;  %263 = vst.msk [vmem:[#allocation2] sm:$0xff] %vm262_vm1, %v803_v1  ;;  %v266_v3 = vld [vmem:[%s1028_s1 + $0x8] sm:$0xff]  ;;  %v265_v4 = vld [vmem:[%s1028_s1] sm:$0xff]  ;;  %v285_v8 = vld [vmem:[%s1030_s3 + $0x78] sm:$0xff]  ;;  %p727_p13 = pnand %p726_p12, %p871_p4  ;;  %s731_s18 = scalar_lea.vmem %s730_s13, 256 }
  0x16   : > { %619 = vmatpush3.msra.mxu0 %v268_v0  ;;  %629 = vmatprep.subr.mxu1 %v803_v1  ;;  %s589_s10 = sshll.u32 %s242_s7, 3  ;;  %v284_v9 = vld [vmem:[%s1030_s3 + $0x70] sm:$0xff]  ;;  %v283_v10 = vld [vmem:[%s1030_s3 + $0x68] sm:$0xff]  ;;  %v282_v11 = vld [vmem:[%s1030_s3 + $0x60] sm:$0xff]  ;;  %p732_p1 = scmp.lt.s32.totalorder %s472_s6, %s730_s13 }
  0x17   : > { %620 = vmatprep.subr.mxu0 %v803_v1  ;;  %661 = vmatprep.mubr.msk.f32.mxu1 %vm804_vm0, %v803_v1  ;;  %s244_s21 = scalar_lea.vmem %s1027_s0, %s589_s10  ;;  %v281_v12 = vld [vmem:[%s1030_s3 + $0x58] sm:$0xff]  ;;  %v280_v13 = vld [vmem:[%s1030_s3 + $0x50] sm:$0xff]  ;;  %v279_v14 = vld [vmem:[%s1030_s3 + $0x48] sm:$0xff]  ;;  %s458_s10 = scalar_lea.sflag [#allocation4], %s238_s26 }
  0x18   : > { %621 = vmatpush3.msra.mxu0 %v267_v2  ;;  %v264_v5 = vld [vmem:[%s244_s21] sm:$0xff]  ;;  %630 = vmatpush3.msra.mxu1 %v285_v8  ;;  %v277_v16 = vld [vmem:[%s1030_s3 + $0x38] sm:$0xff]  ;;  %v276_v17 = vld [vmem:[%s1030_s3 + $0x30] sm:$0xff]  ;;  %p728_p0 = pneg %p727_p13  ;;  %p733_p2 = scmp.lt.s32.totalorder %s731_s18, %s725_s11 }
  0x19   : > { %622 = vmatprep.subr.mxu0 %v803_v1  ;;  %v286_v6 = vmul.f32 %v264_v5, %v264_v5  ;;  %631 = vmatprep.subr.mxu1 %v803_v1  ;;  %v278_v15 = vld [vmem:[%s1030_s3 + $0x40] sm:$0xff]  ;;  %v275_v18 = vld [vmem:[%s1030_s3 + $0x28] sm:$0xff]  ;;  %v273_v20 = vld [vmem:[%s1030_s3 + $0x18] sm:$0xff] }
  0x1a   : > { %623 = vmatpush3.msra.mxu0 %v266_v3  ;;  %632 = vmatpush3.msra.mxu1 %v284_v9  ;;  %v274_v19 = vld [vmem:[%s1030_s3 + $0x20] sm:$0xff]  ;;  %v272_v21 = vld [vmem:[%s1030_s3 + $0x10] sm:$0xff]  ;;  %v271_v22 = vld [vmem:[%s1030_s3 + $0x8] sm:$0xff]  ;;  %p734_p3 = por %p733_p2, %p732_p1 }
  0x1b   : > { %624 = vmatprep.subr.mxu0 %v803_v1  ;;  %v288_v7 = vsel %vm262_vm1, %v286_v6, 0.0  ;;  %633 = vmatprep.subr.mxu1 %v803_v1  ;;  %v270_v23 = vld [vmem:[%s1030_s3] sm:$0xff] }
  0x1c   : > { %625 = vmatpush3.msra.mxu0 %v265_v4  ;;  %289 = vadd.xlane.f32.xlu0 %v288_v7  ;;  %v591_v25 = vld [vmem:[%s1029_s2] ss:$0 sm:$0xff]  ;;  %p735_p5 = pnand %p734_p3, %p728_p0 }
  0x1d   : > { %627 = vmatmul.mubr.msk.f32.vlgmr.msra.gmra.mxu0 %vm262_vm1, %v264_v5  ;;  %634 = vmatpush3.msra.mxu1 %v283_v10  ;;  %v379_v37 = vld [vmem:[#allocation2] sm:$0xff] }
  0x1e   : > { %635 = vmatprep.subr.mxu1 %v803_v1 }
  0x1f   : > { %636 = vmatpush3.msra.mxu1 %v282_v11 }
  0x20   : > { %637 = vmatprep.subr.mxu1 %v803_v1 }
  0x21   : > { %638 = vmatpush3.msra.mxu1 %v281_v12 }
  0x22   : > { %639 = vmatprep.subr.mxu1 %v803_v1 }
  0x23   : > { %640 = vmatpush3.msra.mxu1 %v280_v13 }
  0x24   : > { %641 = vmatprep.subr.mxu1 %v803_v1 }
  0x25   : > { %642 = vmatpush3.msra.mxu1 %v279_v14 }
  0x26   : > { %643 = vmatprep.subr.mxu1 %v803_v1 }
  0x27   : > { %644 = vmatpush3.msra.mxu1 %v278_v15 }
  0x28   : > { %645 = vmatprep.subr.mxu1 %v803_v1 }
  0x29   : > { %646 = vmatpush3.msra.mxu1 %v277_v16 }
  0x2a   : > { %647 = vmatprep.subr.mxu1 %v803_v1 }
  0x2b   : > { %648 = vmatpush3.msra.mxu1 %v276_v17 }
  0x2c   : > { %649 = vmatprep.subr.mxu1 %v803_v1 }
  0x2d   : > { %650 = vmatpush3.msra.mxu1 %v275_v18 }
  0x2e   : > { %651 = vmatprep.subr.mxu1 %v803_v1 }
  0x2f   : > { %652 = vmatpush3.msra.mxu1 %v274_v19 }
  0x30   : > { %653 = vmatprep.subr.mxu1 %v803_v1 }
  0x31   : > { %654 = vmatpush3.msra.mxu1 %v273_v20 }
  0x32   : > { %655 = vmatprep.subr.mxu1 %v803_v1 }
  0x33   : > { %656 = vmatpush3.msra.mxu1 %v272_v21 }
  0x34   : > { %657 = vmatprep.subr.mxu1 %v803_v1 }
  0x35   : > { %658 = vmatpush3.msra.mxu1 %v271_v22 }
  0x36   : > { %659 = vmatprep.subr.mxu1 %v803_v1 }
  0x37   : > { %660 = vmatpush3.msra.mxu1 %v270_v23 }
  0xa5   : > { %v290_v24 = vpop.xlane.xlu0 %289 }
  0xdd   : > { %v360_v26 = vpop.f32.mrf.mxu0 }
  0xde   : > { %v364_v27 = vadd.f32 %v360_v26, %v290_v24 }
  0xdf   : > { %v628_v28 = vpop.f32.mrf.mxu0 }
  0xe0   : > { %v371_v29 = vadd.f32 %v591_v25, %v364_v27 }
  0xe2   : > { %v372_v30 = vmax.f32 %v371_v29, 1e-12 }
  0xe4   : > { %721 = vrsqrt.f32 %v372_v30 }
  0xf1   : > { %v722_v31 = vpop.eup %721 }
  0xf2   : > { %v374_v32 = vmul.f32 %v722_v31, %v372_v30 }
  0xf4   : > { %v375_v33 = vmul.f32 -0.5, %v374_v32 }
  0xf6   : > { %v376_v34 = vmul.f32 1.442695, %v375_v33 }
  0xf8   : > { %723 = vpow2.f32 %v376_v34 }
 0x105   : > { %v724_v35 = vpop.eup %723 }
 0x106   : > { %v378_v36 = vmul.f32 %v724_v35, %v722_v31 }
 0x108   : > { %662 = vmatmul.mubr.f32.vlgmr.msra.gmra.mxu1 %v378_v36 }
 0x1c8   : > { %v446_v38 = vpop.f32.mrf.mxu1 }
 0x1c9   : > { %v450_v39 = vadd.f32 %v446_v38, %v379_v37 }
 0x1ca   : > { %v663_v40 = vpop.f32.mrf.mxu1 }
 0x1cb   : > { %451 = vst.msk [vmem:[#allocation2] sm:$0xff] %vm262_vm1, %v450_v39 }
 0x1d2   : > { %v455_v41 = vld [vmem:[#allocation2] sm:$0xff] }
 0x1d3   : > { %456 = vst.msk [vmem:[%s240_s5] sm:$0xff] %vm262_vm1, %v455_v41 }
 0x1d4   : > { %738 = shalt.err (!%p735_p5)
}
 0x1d5   : > { %s739_s14 = scalar_lea.hbm %s986_s9, 128  ;;  %s743_s24 = scalar_lea.hbm %s1031_s4, 256 }
 0x1d6   : > { %p740_p6 = scmp.ne.s32.totalorder %s986_s9, %s739_s14  ;;  %p744_p10 = scmp.lt.s32.totalorder %s986_s9, %s1031_s4 }
 0x1d7   : > { %p745_p11 = scmp.lt.s32.totalorder %s743_s24, %s739_s14 }
 0x1d8   : > { %p741_p7 = pnand %p740_p6, %p871_p4 }
 0x1d9   : > { %p746_p12 = por %p745_p11, %p744_p10 }
 0x1da   : > { %p742_p9 = pneg %p741_p7 }
 0x1dc   : > { %p747_p13 = pnand %p746_p12, %p742_p9 }
 0x1de   : > { %750 = shalt.err (!%p747_p13)
}
 0x1df   : > { %664 = dma.vmem_to_hbm [thread:$0]  (%p871_p4), %s472_s6, 128, %s986_s9, %s458_s10  }
 0x1e0 PF: > { %p670_p0 = scmp.ge.s32.totalorder %s801_s20, 2  ;;  %s483_s30 = sand.u32 1, %s781_s15  }
 0x1e1   : > { %s484_s5 = scalar_lea.sflag [#allocation4], %s483_s30 }
 0x1e2   : > { %p667_p1 = pnand %p670_p0, %p878_p8 }
 0x1e4   : > { %p668_p2 = pneg %p667_p1 }
 0x1e6   : > { %776 = dma.done.wait (%p668_p2), %s484_s5, 128  }
 0x1e7   : > { %778 = vsyncadd (%p668_p2), %s484_s5, 4294967168  ;;  %s17_s20 = sadd.s32 1, %s801_s20   ;;  %s1034_s15 = smov %s785_s16 }
 0x1e8   : > { %p14_p3 = scmp.ge.s32.totalorder %s17_s20, 4   ;;  %s1035_s16 = smov %s789_s17 }
 0x1e9   : > { %s1036_s17 = smov %s884_s28  ;;  %s1037_s18 = smov %s797_s19 }
 0x1ea   : > { %s1038_s19 = smov %s1040_s23  ;;  %16 = sbr.rel (!%p14_p3) target bundleno = 4 (0x4), region = 88 }
 0x1ef   :  { %489 = vsyncpa [#allocation4], 1 }
 0x1f0   :  { %491 = vsyncpa [#allocation4 + $0x1], 1 }

</bundles_post_ra>
